<compile_context>
chip_gen: v7x
topology: tpu7x:2x2x1
jax: 0.10.0
libtpu: 0.0.40
codegen_flags: <defaults>
</compile_context>

<pallas_src>
import jax
import jax.numpy as jnp
import numpy as np
from jax.experimental import pallas as pl
from jax.experimental.pallas import tpu as pltpu


def _round_up(x, m):
    return (x + m - 1) // m * m


def _cdiv(a, b):
    return (a + b - 1) // b


# ---------------------------------------------------------------------------
# Kernels.  omega_0 is folded into w_ref / b_ref by the wrapper, so the body
# computes:   out = cos(x @ W' + b')   with W' = omega_0*W^T, b' = omega_0*b
# ---------------------------------------------------------------------------
def _sine_layer_kernel(x_ref, w_ref, b_ref, o_ref):
    # x_ref: (tile_b, in_f)  input dtype (cast to weight dtype right at the MXU)
    # w_ref: (in_f, tn)      compute dtype, pre-transposed, lane-dense
    # b_ref: (1, tn)         f32 (omega_0 already folded in)
    # o_ref: (tile_b, tn)
    x = x_ref[...].astype(w_ref.dtype)
    z = jnp.dot(x, w_ref[...], preferred_element_type=jnp.float32)
    o_ref[...] = jnp.cos(z + b_ref[...]).astype(o_ref.dtype)


def _sine_layer_kernel_small_k(x_ref, w_ref, b_ref, o_ref):
    # SIREN first layer (in_features = 2/3 coords): an MXU pass would be >95%
    # padding and the layer is epilogue-bound, so do the K-term FMA on the VPU.
    x = x_ref[...].astype(jnp.float32)      # (tile_b, in_f), in_f <= 8
    w = w_ref[...].astype(jnp.float32)      # (in_f, tn)
    z = x[:, 0:1] * w[0:1, :]
    for k in range(1, x.shape[1]):          # static, tiny trip count
        z = z + x[:, k:k + 1] * w[k:k + 1, :]
    o_ref[...] = jnp.cos(z + b_ref[...]).astype(o_ref.dtype)


def sine_layer(x, weight, bias, *, omega_0=30.0, tile_b=512, tile_n=2048,
               compute_dtype=None, out_dtype=None, vmem_limit_bytes=None):
    """Pallas SineLayer forward: cos(omega_0 * (x @ weight.T + bias)).

    x:      (B, in_features)             float32 (or bf16)
    weight: (out_features, in_features)  float32 (torch.nn.Linear layout)
    bias:   (out_features,)              float32
    """
    B, in_f = x.shape
    out_f, in_f_w = weight.shape
    assert in_f == in_f_w
    if compute_dtype is None:
        compute_dtype = x.dtype              # exact-semantics default
    compute_dtype = jnp.dtype(compute_dtype)
    out_dtype = jnp.dtype(x.dtype if out_dtype is None else out_dtype)

    # Fold omega_0 into the pre-transposed weight and the bias (one-time,
    # O(in_f*out_f) on the small weight; removes the in-kernel scale).
    wt = (weight.T.astype(jnp.float32) * float(omega_0)).astype(compute_dtype)
    b2 = (bias.astype(jnp.float32) * float(omega_0)).reshape(1, out_f)

    # Lane-dense output: pad out_features to a multiple of 128 (weight/bias
    # only; the output padding is sliced off at the end).
    out_p = _round_up(out_f, 128)
    if out_p != out_f:
        wt = jnp.pad(wt, ((0, 0), (0, out_p - out_f)))
        b2 = jnp.pad(b2, ((0, 0), (0, out_p - out_f)))

    # Optional out_features (N) tiling for very wide layers (v7x 64 MiB VMEM).
    tn = out_p
    if tile_n is not None:
        tn_cap = _round_up(int(tile_n), 128)
        if out_p > tn_cap:
            tn = tn_cap
    n_tiles = _cdiv(out_p, tn)

    # Batch tiling.  No wrapper-side padding of x: cdiv grid + masked last
    # block (padded rows are never written back).
    sub = 16 if compute_dtype.itemsize == 2 else 8
    if B <= 256:
        tile_b = _round_up(max(B, 1), sub)
    else:
        tile_b = _round_up(min(int(tile_b), B), 128)
        if _cdiv(B, tile_b) < 2:             # keep both v7x TensorCores busy
            tile_b = _round_up(_cdiv(B, 2), 128)
    b_tiles = _cdiv(B, tile_b)

    small_k = in_f <= 8
    kernel = _sine_layer_kernel_small_k if small_k else _sine_layer_kernel

    # VMEM budget: weight/bias single-buffered when resident, otherwise double;
    # x/out double-buffered; account for (sublane, lane) padding of each block.
    c_isz = compute_dtype.itemsize
    o_isz = out_dtype.itemsize
    x_isz = jnp.dtype(x.dtype).itemsize
    w_bufs = 1 if n_tiles == 1 else 2
    in_f_sub = _round_up(in_f, 16 if c_isz == 2 else 8)
    in_f_lane = _round_up(in_f, 128)
    est = (w_bufs * in_f_sub * tn * c_isz            # W' block(s)
           + w_bufs * 8 * tn * 4                      # bias block (sublane pad)
           + 2 * tile_b * in_f_lane * x_isz           # streamed x tiles
           + 2 * tile_b * tn * o_isz)                 # streamed out tiles
    if vmem_limit_bytes is None and est * 1.3 > 16 * 1024 * 1024:
        # 16 MiB is the smallest default scoped limit (v5e).  Clamp the raise
        # to 85% of physical VMEM (v7x: 64 MiB/TC, v5e/v6e: 128 MiB).
        try:
            phys = int(pltpu.get_tpu_info().vmem_capacity_bytes)
        except Exception:
            phys = 64 * 1024 * 1024                   # conservative (v7x)
        vmem_limit_bytes = min(max(int(est * 1.5), 32 * 1024 * 1024),
                               int(0.85 * phys))

    # Weight/bias index maps are constant over the batch axis; when they are
    # also constant over N (n_tiles == 1) single-buffer them.
    res_mode = pl.Buffered(1) if n_tiles == 1 else None

    out = pl.pallas_call(
        kernel,
        out_shape=jax.ShapeDtypeStruct((B, out_p), out_dtype),
        grid_spec=pl.GridSpec(
            grid=(b_tiles, n_tiles),
            in_specs=[
                pl.BlockSpec((tile_b, in_f), lambda i, j: (i, 0)),   # x stream
                pl.BlockSpec((in_f, tn), lambda i, j: (0, j),
                             pipeline_mode=res_mode),                # W'
                pl.BlockSpec((1, tn), lambda i, j: (0, j),
                             pipeline_mode=res_mode),                # bias
            ],
            out_specs=pl.BlockSpec((tile_b, tn), lambda i, j: (i, j)),
        ),
        compiler_params=pltpu.CompilerParams(
            dimension_semantics=("parallel", "arbitrary"),
            vmem_limit_bytes=vmem_limit_bytes,
        ),
    )(x, wt, b2)

    return out if out_p == out_f else out[:, :out_f]


def init_sine_layer_params(key, in_features, out_features, *, is_first=False,
                           omega_0=30.0):
    """SIREN init matching SineLayer.init_weights (uniform ranges)."""
    kw, kb = jax.random.split(key)
    if is_first:
        bound_w = 1.0 / in_features
    else:
        bound_w = float(np.sqrt(6.0 / in_features)) / omega_0
    weight = jax.random.uniform(
        kw, (out_features, in_features), jnp.float32, -bound_w, bound_w)
    # nn.Linear default bias init: U(-1/sqrt(in_features), 1/sqrt(in_features))
    bound_b = 1.0 / float(np.sqrt(in_features))
    bias = jax.random.uniform(
        kb, (out_features,), jnp.float32, -bound_b, bound_b)
    return weight, bias


if __name__ == "__main__":
    key = jax.random.PRNGKey(0)
    k_x, k_p, k_x2, k_p2 = jax.random.split(key, 4)
    omega_0 = 30.0

    # --- hidden-layer shape: MXU path + lane-density padding (64 -> 128) ----
    batch, in_features, out_features = 8, 32, 64
    x = jax.random.normal(k_x, (batch, in_features), jnp.float32)
    weight, bias = init_sine_layer_params(
        k_p, in_features, out_features, is_first=False, omega_0=omega_0)

    # f32 path: module semantics cos(omega_0 * (x @ W^T + b)).
    ref_f32 = jnp.cos(omega_0 * (x @ weight.T + bias))
    out_f32 = jax.block_until_ready(
        sine_layer(x, weight, bias, omega_0=omega_0))
    np.testing.assert_allclose(np.asarray(out_f32), np.asarray(ref_f32),
                               rtol=1e-4, atol=1e-4)

    # bf16 matmul + bf16 writeback path (v6e/v7x); reference uses the same
    # folded/bf16 formulation so the tolerance stays meaningful.
    z_bf16 = jnp.dot(x.astype(jnp.bfloat16),
                     (omega_0 * weight.T).astype(jnp.bfloat16),
                     preferred_element_type=jnp.float32) + omega_0 * bias
    ref_bf16 = jnp.cos(z_bf16)
    out_bf16 = jax.block_until_ready(
        sine_layer(x, weight, bias, omega_0=omega_0,
                   compute_dtype=jnp.bfloat16, out_dtype=jnp.bfloat16))
    np.testing.assert_allclose(np.asarray(out_bf16, dtype=np.float32),
                               np.asarray(ref_bf16), rtol=1e-2, atol=1e-2)

    # --- first-layer shape (2-D coords): VPU small-K path -------------------
    batch1, in1, out1 = 8, 2, 64
    x1 = jax.random.normal(k_x2, (batch1, in1), jnp.float32)
    w1, b1 = init_sine_layer_params(
        k_p2, in1, out1, is_first=True, omega_0=omega_0)
    z1 = x1[:, 0:1] * w1.T[0:1, :] + x1[:, 1:2] * w1.T[1:2, :] + b1
    ref1 = jnp.cos(omega_0 * z1)
    out1_k = jax.block_until_ready(sine_layer(x1, w1, b1, omega_0=omega_0))
    np.testing.assert_allclose(np.asarray(out1_k), np.asarray(ref1),
                               rtol=1e-4, atol=1e-4)

    print("KERNEL_OK")
</pallas_src>

<mosaic_0001>
module attributes {stable_mosaic.version = 11 : i64} {
  func.func @_sine_layer_kernel(%arg0: i32, %arg1: i32, %arg2: memref<8x32xf32, #tpu.memory_space<vmem>>, %arg3: memref<32x128xf32, #tpu.memory_space<vmem>>, %arg4: memref<1x128xf32, #tpu.memory_space<vmem>>, %arg5: memref<8x128xf32, #tpu.memory_space<vmem>>) attributes {dimension_semantics = [#tpu.dimension_semantics<parallel>, #tpu.dimension_semantics<arbitrary>], iteration_bounds = array<i64: 1, 1>, scalar_prefetch = 0 : i64, scratch_operands = 0 : i64, tpu.core_type = #tpu.core_type<tc>, window_params = [{transform_indices = @transform_0, window_bounds = array<i64: 8, 32>}, {pipeline_mode = #tpu.pipeline_mode<synchronous>, transform_indices = @transform_1, window_bounds = array<i64: 32, 128>}, {pipeline_mode = #tpu.pipeline_mode<synchronous>, transform_indices = @transform_2, window_bounds = array<i64: 1, 128>}, {transform_indices = @transform_3, window_bounds = array<i64: 8, 128>}]} {
    %c0 = arith.constant 0 : index
    %c0_0 = arith.constant 0 : index
    %0 = vector.load %arg2[%c0, %c0_0] : memref<8x32xf32, #tpu.memory_space<vmem>>, vector<8x32xf32>
    %c0_1 = arith.constant 0 : index
    %c0_2 = arith.constant 0 : index
    %1 = vector.load %arg3[%c0_1, %c0_2] : memref<32x128xf32, #tpu.memory_space<vmem>>, vector<32x128xf32>
    %cst = arith.constant dense<0.000000e+00> : vector<8x128xf32>
    %2 = tpu.matmul %0, %1, %cst {dimension_numbers = #tpu.dot_dimension_numbers<[1], [0], [0], [1], [0, 0, 1, 1], [], []>} : vector<8x32xf32>, vector<32x128xf32>, vector<8x128xf32> -> vector<8x128xf32>
    %c0_3 = arith.constant 0 : index
    %c0_4 = arith.constant 0 : index
    %3 = vector.load %arg4[%c0_3, %c0_4] : memref<1x128xf32, #tpu.memory_space<vmem>>, vector<1x128xf32>
    %4 = vector.broadcast %3 : vector<1x128xf32> to vector<8x128xf32>
    %5 = arith.addf %2, %4 : vector<8x128xf32>
    %6 = math.cos %5 : vector<8x128xf32>
    %c0_5 = arith.constant 0 : index
    %c0_6 = arith.constant 0 : index
    %7 = vector.load %arg5[%c0_5, %c0_6] : memref<8x128xf32, #tpu.memory_space<vmem>>, vector<8x128xf32>
    tpu.vector_store %arg5[%c0_5, %c0_6], %6 {strides = array<i32>} : memref<8x128xf32, #tpu.memory_space<vmem>>, vector<8x128xf32>,
    return
  }
  func.func @transform_0(%arg0: i32, %arg1: i32) -> (i32, i32) {
    %c0_i32 = arith.constant 0 : i32
    %c0_i32_0 = arith.constant 0 : i32
    return %arg0, %c0_i32 : i32, i32
  }
  func.func @transform_1(%arg0: i32, %arg1: i32) -> (i32, i32) {
    %c0_i32 = arith.constant 0 : i32
    %c0_i32_0 = arith.constant 0 : i32
    return %c0_i32, %arg1 : i32, i32
  }
  func.func @transform_2(%arg0: i32, %arg1: i32) -> (i32, i32) {
    %c0_i32 = arith.constant 0 : i32
    %c0_i32_0 = arith.constant 0 : i32
    return %c0_i32, %arg1 : i32, i32
  }
  func.func @transform_3(%arg0: i32, %arg1: i32) -> (i32, i32) {
    %c0_i32 = arith.constant 0 : i32
    return %arg0, %arg1 : i32, i32
  }
}

</mosaic_0001>

<bundles_post_ra>
// kernel: tpu_custom_call.1
= control target key start
LH: loop header
LB: loop body
LE: loop exit
PB: predicated region body
PF: predicated region fallthrough
CT: control target
= control target key end

     0   :  { %8 = vsyncpa [#allocation3], 0  ;;  %s470_s0 = inlined_call_operand.hbm [shape: f32[8,32], index: 0, kind: input, shape index: {}]   ;;  %s471_s1 = inlined_call_operand.hbm [shape: f32[32,128], index: 1, kind: input, shape index: {}]   ;;  %s472_s2 = inlined_call_operand.vmem [shape: f32[1,128], index: 2, kind: input, shape index: {}]   ;;  %s473_s3 = inlined_call_operand.hbm [shape: f32[8,128], index: 3, kind: output, shape index: {}]  }
   0x1   :  { %9 = vsyncpa [#allocation6], 0 }
   0x2   :  { %10 = vsyncpa [#allocation4], 0  ;;  %s369_s12 = smov [#allocation2]   ;;  %s370_s14 = smov [#allocation5]  }
   0x3   :  { %s17_s13 = sshll.u32 %s369_s12, 4  ;;  %s26_s15 = sshll.u32 %s370_s14, 4  ;;  %s18_s13 = int_to_ptr.vmem [resolvable:$true] %s17_s13  ;;  %s403_s15 = int_to_ptr.vmem [resolvable:$true] %s26_s15 }
   0x4   :  { %s297_s18 = scalar_lea.hbm %s470_s0, 128 }
   0x5   :  { %p298_p0 = scmp.ne.s32.totalorder %s470_s0, %s297_s18  ;;  %p301_p1 = scmp.lt.u32.totalorder %s297_s18, %s470_s0 }
   0x7   :  { %p303_p2 = pnand %p301_p1, %p298_p0 }
   0x9   :  { %306 = shalt.err (!%p303_p2)
}
   0xa   :  { %s307_s23 = scalar_lea.vmem %s18_s13, 128  ;;  %p312_p4 = scmp.lt.s32.totalorder %s18_s13, %s18_s13 }
   0xb   :  { %p308_p3 = scmp.ne.s32.totalorder %s18_s13, %s307_s23  ;;  %p313_p5 = scmp.lt.s32.totalorder %s307_s23, %s307_s23 }
   0xd   :  { %p314_p6 = por %p313_p5, %p312_p4 }
   0xf   :  { %p315_p7 = pnand %p314_p6, %p308_p3 }
  0x11   :  { %318 = shalt.err (!%p315_p7)
}
  0x12   :  { %20 = dma.hbm_to_vmem [thread:$0]  %s470_s0, 128, %s18_s13, [#allocation3]  }
  0x13   :  { %s319_s28 = scalar_lea.hbm %s471_s1, 512 }
  0x14   :  { %p320_p8 = scmp.ne.s32.totalorder %s471_s1, %s319_s28  ;;  %p323_p9 = scmp.lt.u32.totalorder %s319_s28, %s471_s1 }
  0x16   :  { %p325_p10 = pnand %p323_p9, %p320_p8 }
  0x18   :  { %328 = shalt.err (!%p325_p10)
}
  0x19   :  { %s329_s6 = scalar_lea.vmem %s403_s15, 512  ;;  %p334_p12 = scmp.lt.s32.totalorder %s403_s15, %s403_s15 }
  0x1a   :  { %p330_p11 = scmp.ne.s32.totalorder %s403_s15, %s329_s6  ;;  %p335_p13 = scmp.lt.s32.totalorder %s329_s6, %s329_s6 }
  0x1c   :  { %p336_p0 = por %p335_p13, %p334_p12 }
  0x1e   :  { %p337_p1 = pnand %p336_p0, %p330_p11 }
  0x20   :  { %340 = shalt.err (!%p337_p1)
}
  0x21   :  { %s371_s0 = smov 128   ;;  %s372_s7 = smov 8  }
  0x22   :  { %32 = dma.hbm_to_vmem [thread:$0]  %s471_s1, 512, %s403_s15, [#allocation6], %s371_s0, %s371_s0, %s372_s7  }
  0x23   :  { %363 = dma.done.wait [#allocation3], 128  }
  0x24   :  { %364 = vsyncadd [#allocation3], 4294967168 }
  0x25   :  { %365 = dma.done.wait [#allocation6], 512  }
  0x26   :  { %366 = vsyncadd [#allocation6], 4294966784  ;;  %v373_v0 = vmov 0.0|0.0   ;;  %vm374_vm0 = vmmov 0   ;;  %v375_v1 = vmov 0.0   ;;  %v42_v2 = vld [vmem:[#allocation5] sm:$0xff] }
  0x27   :  { %269 = vmatprep.subr.bf16.mxu0 %v373_v0  ;;  %266 = vmatprep.mubr.msk.f32.mxu0 %vm374_vm0, %v375_v1  ;;  %v43_v3 = vld [vmem:[#allocation5 + $0x8] sm:$0xff]  ;;  %v44_v4 = vld [vmem:[#allocation5 + $0x10] sm:$0xff]  ;;  %v45_v6 = vld [vmem:[#allocation5 + $0x18] sm:$0xff]  ;;  %vm53_vm1 = vcmask 261120   ;;  %v376_v23 = vmov 683565275  }
  0x28   :  { %v270_v5 = vpack.c.bf16 %v43_v3, %v42_v2  ;;  %v273_v7 = vpack.c.bf16 %v45_v6, %v44_v4  ;;  %v41_v8 = vld [vmem:[#allocation2] sm:$0xff]  ;;  %v377_v25 = vmov 2475754826   ;;  %v378_v28 = vmov 2131351028  }
  0x29   :  { %v247_v9 = vld [vmem:[%s472_s2] ss:$0 sm:$0xff]  ;;  %v379_v31 = vmov 2102212464   ;;  %v380_v34 = vmov 920167782  }
  0x2a   :  { %271 = vmatpush3.bf16.msra.mxu0 %v270_v5  ;;  %v381_v37 = vmov 1326507024   ;;  %s382_s2 = smov [#allocation7]  }
  0x2b   :  { %272 = vmatprep.subr.bf16.mxu0 %v373_v0  ;;  %s237_s11 = sshll.u32 %s382_s2, 4  ;;  %s238_s11 = int_to_ptr.vmem [resolvable:$true] %s237_s11 }
  0x2c   :  { %s341_s12 = scalar_lea.vmem %s238_s11, 128  ;;  %p346_p3 = scmp.lt.s32.totalorder %s238_s11, %s238_s11 }
  0x2d   :  { %p342_p2 = scmp.ne.s32.totalorder %s238_s11, %s341_s12  ;;  %p347_p4 = scmp.lt.s32.totalorder %s341_s12, %s341_s12 }
  0x2e   :  { %274 = vmatpush3.bf16.msra.mxu0 %v273_v7 }
  0x2f   :  { %p348_p5 = por %p347_p4, %p346_p3 }
  0x31   :  { %267 = vmatmul.mubr.msk.f32.vlgmr.msra.gmra.mrb[0].mxu0 %vm53_vm1, %v41_v8  ;;  %p349_p6 = pnand %p348_p5, %p342_p2 }
 0x104   :  { %v123_v10 = vpop.f32.mrb[0].mxu0 }
 0x105   :  { %v437_v11 = vadd.f32 %v247_v9, %v123_v10  ;;  %v268_v12 = vpop.f32.mrb[1].mxu0 }
 0x107   :  { %v130_v13 = vand.u32 2139095040, %v437_v11  ;;  %v127_v17 = vand.u32 2147483647, %v437_v11  ;;  %vm129_vm9 = vcmp.lt.s32.totalorder %v437_v11, 0  ;;  %vm219_vm14 = vweird.f32 %v437_v11 }
 0x109   :  { %v131_v14 = vshrl.u32 %v130_v13, 23  ;;  %v134_v20 = vand.u32 8388607, %v127_v17  ;;  %vm128_vm10 = vcmp.le.f32.partialorder %v127_v17, 0.7853982 }
 0x10b   :  { %v249_v15 = vadd.s32 4294967169, %v131_v14  ;;  %v135_v39 = vor.u32 8388608, %v134_v20 }
 0x10d   :  { %v137_v16 = vadd.s32 1, %v249_v15  ;;  %v175_v53 = vshll.u32 %v135_v39, 8 }
 0x10f   :  { %vm138_vm2 = vcmp.gt.s32.totalorder %v137_v16, 0 }
 0x110   :  { %v139_v18 = vsel %vm138_vm2, %v137_v16, 0 }
 0x111   :  { %v141_v19 = vand.u32 31, %v139_v18  ;;  %v140_v22 = vshrl.u32 %v139_v18, 5 }
 0x113   :  { %v142_v21 = vsub.s32 32, %v141_v19  ;;  %v144_v24 = vshll.u32 %v376_v23, %v141_v19  ;;  %v147_v26 = vshll.u32 %v377_v25, %v141_v19  ;;  %v150_v30 = vshll.u32 %v378_v28, %v141_v19 }
 0x114   :  { %v153_v33 = vshll.u32 %v379_v31, %v141_v19  ;;  %v156_v36 = vshll.u32 %v380_v34, %v141_v19  ;;  %vm159_vm3 = vcmp.lt.s32.totalorder %v140_v22, 1  ;;  %vm162_vm4 = vcmp.lt.s32.totalorder %v140_v22, 4 }
 0x115   :  { %v145_v27 = vshrl.u32 %v377_v25, %v142_v21  ;;  %v148_v29 = vshrl.u32 %v378_v28, %v142_v21  ;;  %v151_v32 = vshrl.u32 %v379_v31, %v142_v21  ;;  %v154_v35 = vshrl.u32 %v380_v34, %v142_v21 }
 0x116   :  { %v157_v38 = vshrl.u32 %v381_v37, %v142_v21  ;;  %v143_v48 = vshrl.u32 %v376_v23, %v142_v21  ;;  %vm161_vm5 = vcmp.lt.s32.totalorder %v140_v22, 3  ;;  %vm160_vm6 = vcmp.lt.s32.totalorder %v140_v22, 2 }
 0x117   :  { %v146_v40 = vor.u32 %v145_v27, %v144_v24  ;;  %v149_v41 = vor.u32 %v148_v29, %v147_v26  ;;  %v152_v42 = vor.u32 %v151_v32, %v150_v30  ;;  %v155_v43 = vor.u32 %v154_v35, %v153_v33 }
 0x118   :  { %v158_v44 = vor.u32 %v157_v38, %v156_v36 }
 0x119   :  { %v164_v45 = vsel %vm162_vm4, %v152_v42, 2102212464  ;;  %v167_v46 = vsel %vm159_vm3, %v146_v40, %v149_v41  ;;  %v171_v47 = vsel %vm159_vm3, %v149_v41, %v152_v42  ;;  %v168_v49 = vsel %vm162_vm4, %v155_v43, 920167782 }
 0x11a   :  { %v172_v50 = vsel %vm162_vm4, %v158_v44, 1326507024  ;;  %v169_v51 = vsel %vm161_vm5, %v152_v42, %v168_v49  ;;  %v163_v54 = vsel %vm159_vm3, %v143_v48, %v146_v40  ;;  %v165_v55 = vsel %vm161_vm5, %v149_v41, %v164_v45 }
 0x11b   :  { %v173_v52 = vsel %vm161_vm5, %v155_v43, %v172_v50  ;;  %v170_v56 = vsel %vm160_vm6, %v167_v46, %v169_v51  ;;  %v166_v62 = vsel %vm160_vm6, %v163_v54, %v165_v55 }
 0x11c   :  { %v174_v57 = vsel %vm160_vm6, %v171_v47, %v173_v52  ;;  %v446_v60 = vmul.u32.u64.low %v175_v53, %v170_v56  ;;  %v447_v61 = vmul.u32.u64.high %v175_v53, %v170_v56, %v446_v60  ;;  %v182_v0 = vmul.u32 %v175_v53, %v166_v62 }
 0x11d   :  { %v443_v58 = vmul.u32.u64.low %v175_v53, %v174_v57  ;;  %v444_v59 = vmul.u32.u64.high %v175_v53, %v174_v57, %v443_v58 }
 0x11e   :  { %v185_v63 = vadd.s32 1, %v447_v61 }
 0x11f   :  { %vm184_vm7 = vc.u32 %v444_v59, %v446_v60  ;;  %v183_v13 = vadd.s32 %v446_v60, %v444_v59 }
 0x120   :  { %v186_v1 = vsel %vm184_vm7, %v185_v63, %v447_v61 }
 0x121   :  { %v187_v2 = vadd.s32 %v186_v1, %v182_v0 }
 0x123   :  { %v188_v3 = vadd.s32 536870912, %v187_v2 }
 0x125   :  { %v189_v4 = vshrl.u32 %v188_v3, 30 }
 0x127   :  { %v190_v5 = vshll.u32 %v189_v4, 30  ;;  %v213_v28 = vsub.s32 4, %v189_v4 }
 0x129   :  { %v191_v6 = vsub.s32 %v187_v2, %v190_v5  ;;  %v214_v30 = vsel %vm129_vm9, %v213_v28, %v189_v4 }
 0x12a   :  { %v216_v31 = vsel %vm128_vm10, 0, %v214_v30 }
 0x12b   :  { %v193_v7 = vsub.s32 0, %v191_v6  ;;  %v220_v32 = vand.u32 3, %v216_v31 }
 0x12d   :  { %v250_v8 = vmin.u32 %v193_v7, %v191_v6  ;;  %vm225_vm11 = vcmp.eq.s32.totalorder %v220_v32, 2  ;;  %vm222_vm12 = vcmp.eq.s32.totalorder %v220_v32, 0  ;;  %vm221_vm13 = vcmp.lt.s32.totalorder %v220_v32, 2 }
 0x12f   :  { %v195_v9 = vclz %v250_v8 }
 0x131   :  { %v251_v10 = vadd.s32 4294967294, %v195_v9 }
 0x133   :  { %vm252_vm8 = vcmp.lt.s32.totalorder %v251_v10, 0 }
 0x134   :  { %v198_v12 = vsel %vm252_vm8, 0, %v251_v10 }
 0x135   :  { %v199_v14 = vsub.s32 32, %v198_v12  ;;  %v203_v15 = vsub.s32 4294967266, %v198_v12  ;;  %v200_v16 = vshll.u32 %v191_v6, %v198_v12 }
 0x137   :  { %v201_v18 = vshrl.u32 %v183_v13, %v199_v14  ;;  %v204_v19 = vadd.s32 127, %v203_v15 }
 0x139   :  { %v202_v20 = vor.u32 %v201_v18, %v200_v16  ;;  %v205_v21 = vshll.u32 %v204_v19, 23 }
 0x13b   :  { %v206_v22 = vor.u32 4788187, %v205_v21  ;;  %v209_v24 = vcvt.s32.f32 %v202_v20 }
 0x13d   :  { %v207_v23 = vand.u32 2147483647, %v206_v22 }
 0x13f   :  { %v210_v25 = vmul.f32 %v209_v24, %v207_v23 }
 0x141   :  { %v211_v26 = vxor.u32 2147483648, %v210_v25 }
 0x143   :  { %v212_v27 = vsel %vm129_vm9, %v211_v26, %v210_v25 }
 0x144   :  { %v215_v29 = vsel %vm128_vm10, %v437_v11, %v212_v27 }
 0x145   :  { %293 = vcosq.f32 %v215_v29 }
 0x146   :  { %295 = vsinq.f32 %v215_v29 }
 0x14f   :  { %v294_v33 = vpop.eup %293 }
 0x150   :  { %v296_v34 = vpop.eup %295  ;;  %v226_v35 = vxor.u32 2147483648, %v294_v33 }
 0x151   :  { %v223_v36 = vxor.u32 2147483648, %v296_v34 }
 0x152   :  { %v227_v37 = vsel %vm225_vm11, %v226_v35, %v296_v34 }
 0x153   :  { %v224_v38 = vsel %vm222_vm12, %v294_v33, %v223_v36 }
 0x154   :  { %v228_v17 = vsel %vm221_vm13, %v224_v38, %v227_v37 }
 0x155   :  { %v229_v39 = vsel %vm219_vm14, nan, %v228_v17 }
 0x156   :  { %230 = vst [vmem:[#allocation7] sm:$0xff] %v229_v39 }
 0x157   :  { %352 = shalt.err (!%p349_p6)
}
 0x158   :  { %s353_s15 = scalar_lea.hbm %s473_s3, 128 }
 0x159   :  { %p354_p7 = scmp.ne.s32.totalorder %s473_s3, %s353_s15  ;;  %p357_p8 = scmp.lt.u32.totalorder %s353_s15, %s473_s3 }
 0x15b   :  { %p359_p9 = pnand %p357_p8, %p354_p7 }
 0x15d   :  { %362 = shalt.err (!%p359_p9)
}
 0x15e   :  { %240 = dma.vmem_to_hbm [thread:$0]  %s238_s11, 128, %s473_s3, [#allocation4]  }
 0x15f   :  { %367 = dma.done.wait [#allocation4], 128  }
 0x160   :  { %368 = vsyncadd [#allocation4], 4294967168 }
 0x161   :  { %244 = vsyncpa [#allocation3], 1 }
 0x162   :  { %245 = vsyncpa [#allocation6], 1 }
 0x163   :  { %246 = vsyncpa [#allocation4], 1 }

</bundles_post_ra>
